<compile_context>
chip_gen: v7x
topology: tpu7x:2x2x1
jax: 0.10.0
libtpu: 0.0.40
codegen_flags: <defaults>
</compile_context>

<pallas_src>
import functools

import jax
import jax.numpy as jnp
from jax import lax
from jax.experimental import pallas as pl
from jax.experimental.pallas import tpu as pltpu

_SUB = 8  # sublanes per vreg


def _dice_partial_kernel(pred_ref, tgt_ref, num_ref, den_ref, num_acc, den_acc, *,
                         exponent, ignore_index, hw_total, l_valid, lane_tile,
                         k_per_split, need_mask, direct):
    # pred_ref: (1, C, 8, lt) logits (native dtype)   tgt_ref: (1, 1, 8, lt) int32
    # num_ref / den_ref: (1, 1, C) f32 outputs, VMEM-resident across the k axis
    # num_acc / den_acc: (C, 8, 128) f32 VMEM scratch (only used when not `direct`)
    k = pl.program_id(2)

    x = pred_ref[0].astype(jnp.float32)          # (C, 8, lt) — upcast in-kernel
    t = tgt_ref[0, 0]                            # (8, lt) int labels
    C = x.shape[0]

    # Softmax over the class axis (leading, non-vreg dim): plain VPU max/add across C
    # slabs; per-pixel max / reciprocal are (8, lt) vregs shared by every class slab.
    m = jnp.max(x, axis=0)                       # (8, lt)
    e = jnp.exp(x - m)                           # (C, 8, lt)
    inv = 1.0 / jnp.sum(e, axis=0)               # (8, lt) — exact reciprocal (review)
    p = e * inv                                  # (C, 8, lt)

    clamped = jnp.clip(t, 0, C - 1)              # (8, lt)
    valid = t != ignore_index                    # (8, lt)
    cls_ids = lax.broadcasted_iota(jnp.int32, p.shape, 0)
    is_cls = cls_ids == clamped                  # one-hot as bool, (C, 8, lt)

    if exponent == 2:
        pexp = p * p                             # never lower to transcendental pow
    else:
        pexp = p ** exponent                     # static int exponent -> repeated muls

    vmask = valid                                # (8, lt)
    # denominator term: p**exp + one_hot**exp ; one_hot in {0,1} so one_hot**exp == one_hot.
    # (valid mask intentionally NOT applied here — matches mmseg binary_dice_loss.)
    den_elem = pexp + is_cls.astype(jnp.float32)
    if need_mask:
        # Host-side padding (flat-to-8 and/or lane padding) must contribute 0 to both sums.
        start = (pl.program_id(1) * k_per_split + k) * lane_tile
        lane = start + lax.broadcasted_iota(jnp.int32, t.shape, 1)       # (8, lt)
        flat = lax.broadcasted_iota(jnp.int32, t.shape, 0) * l_valid + lane
        in_bounds = jnp.logical_and(lane < l_valid, flat < hw_total)     # (8, lt)
        vmask = jnp.logical_and(vmask, in_bounds)
        den_elem = jnp.where(in_bounds, den_elem, 0.0)
    # numerator term: p * one_hot * valid == where(one_hot & valid [& in_bounds], p, 0)
    num_elem = jnp.where(jnp.logical_and(is_cls, vmask), p, 0.0)

    if direct:
        # Single lane-tile per (batch, split): reduce straight into the output block.
        num_ref[0, 0] = jnp.sum(jnp.sum(num_elem, axis=2), axis=1)       # (C,)
        den_ref[0, 0] = jnp.sum(jnp.sum(den_elem, axis=2), axis=1)
    else:
        @pl.when(k == 0)
        def _init():
            num_acc[...] = jnp.zeros_like(num_acc)
            den_acc[...] = jnp.zeros_like(den_acc)

        # Lane-dense accumulation: fold lt lanes down to 128 with vreg-aligned VPU adds
        # (static 128-multiple slices => no relayout, no per-tile XLU cross-lane reduce,
        #  no per-tile narrow store to the output block).
        nchunks = lane_tile // 128

        def _chunk_sum(v):
            acc = v[:, :, 0:128]
            for j in range(1, nchunks):
                acc = acc + v[:, :, j * 128:(j + 1) * 128]
            return acc

        num_acc[...] += _chunk_sum(num_elem)
        den_acc[...] += _chunk_sum(den_elem)

        @pl.when(k == k_per_split - 1)
        def _finalize():
            # Single cross-lane/sublane reduce + single (C,)-wide store per (n, s).
            num_ref[0, 0] = jnp.sum(jnp.sum(num_acc[...], axis=2), axis=1)
            den_ref[0, 0] = jnp.sum(jnp.sum(den_acc[...], axis=2), axis=1)


def _vmem_capacity_bytes():
    try:
        v = int(pltpu.get_tpu_info().vmem_capacity_bytes)
        if v > 0:
            return v
    except Exception:
        pass
    return 128 * 1024 * 1024


def _num_tensorcores():
    try:
        info = pltpu.get_tpu_info()
    except Exception:
        return 1
    for attr in ("num_cores", "num_tensorcores", "tensor_cores_per_chip",
                 "cores_per_chip", "core_count"):
        v = getattr(info, attr, None)
        try:
            if v is not None and int(v) > 1:
                return int(v)
        except (TypeError, ValueError):
            pass
    return 1


def _pick_lane_tile(l0, max_lt):
    if l0 <= max_lt:
        return l0                                 # single full-extent tile, no padding
    if l0 % 128 == 0:                             # prefer a divisor => statically no mask
        for cand in range(max_lt, 127, -128):
            if l0 % cand == 0:
                return cand
    return max_lt                                 # needs lane padding + in-kernel mask


def dice_loss_forward(pred, target, *, smooth=1.0, exponent=2, class_weight=None,
                      loss_weight=1.0, ignore_index=255, reduction='mean',
                      lane_tile=None):
    """Pallas equivalent of mmseg DiceLoss.forward (returns a scalar)."""
    assert reduction in ('none', 'mean', 'sum')
    N, C, H, W = pred.shape
    HW = H * W

    # Fold the spatial axis into (8 sublanes, L lanes) so every vreg is fully occupied
    # even for small C.  Row-major reshape => free when HW % 8 == 0.
    pad0 = (-HW) % _SUB
    l_valid = (HW + pad0) // _SUB
    pred_flat = pred.reshape(N, C, HW)                       # native dtype (f32 / bf16)
    tgt_flat = target.reshape(N, 1, HW).astype(jnp.int32)
    if pad0:
        pred_flat = jnp.pad(pred_flat, ((0, 0), (0, 0), (0, pad0)))
        tgt_flat = jnp.pad(tgt_flat, ((0, 0), (0, 0), (0, pad0)),
                           constant_values=int(ignore_index))
    pred_r = pred_flat.reshape(N, C, _SUB, l_valid)
    tgt_r = tgt_flat.reshape(N, 1, _SUB, l_valid)

    # VMEM-aware tile sizing: ~3 MiB per fused (C, 8, lt) f32 temporary on 128 MiB parts,
    # ~1.5 MiB on 64 MiB (v7x) parts; vmem_limit stays <= ~5/8 of physical capacity.
    vmem_cap = _vmem_capacity_bytes()
    temp_budget = (3 << 20) if vmem_cap > (64 << 20) else (3 << 19)
    max_lt = max(128, min(8192, (temp_budget // (4 * C * _SUB)) // 128 * 128))

    if lane_tile is not None:
        lt = int(lane_tile)
        lt = l_valid if lt >= l_valid else max(128, (lt // 128) * 128)
    else:
        lt = _pick_lane_tile(l_valid, max_lt)

    if lt >= l_valid:
        lt = l_valid
        k_total = 1
        l_pad = l_valid
    else:
        k_total = -(-l_valid // lt)
        l_pad = k_total * lt
        if l_pad > l_valid:
            pred_r = jnp.pad(pred_r, ((0, 0), (0, 0), (0, 0), (0, l_pad - l_valid)))
            tgt_r = jnp.pad(tgt_r, ((0, 0), (0, 0), (0, 0), (0, l_pad - l_valid)),
                            constant_values=int(ignore_index))
    need_mask = (pad0 > 0) or (l_pad > l_valid)

    # Shard a single batch element's spatial reduction across TensorCores only on parts
    # that actually report >1 core (v7x); never in a way that would add masked tiles.
    ncores = _num_tensorcores()
    nsplit = ncores if (N == 1 and ncores > 1 and k_total % ncores == 0) else 1
    k_per_split = k_total // nsplit
    direct = (k_per_split == 1)
    assert direct or (lt % 128 == 0)

    exp_static = int(exponent) if float(exponent) == int(exponent) else float(exponent)
    kernel = functools.partial(
        _dice_partial_kernel, exponent=exp_static, ignore_index=int(ignore_index),
        hw_total=HW, l_valid=int(l_valid), lane_tile=int(lt),
        k_per_split=int(k_per_split), need_mask=bool(need_mask), direct=bool(direct))

    vmem_limit = int(min(48 << 20, max(16 << 20, (vmem_cap * 5) // 8)))

    num_p, den_p = pl.pallas_call(
        kernel,
        out_shape=(jax.ShapeDtypeStruct((N, nsplit, C), jnp.float32),
                   jax.ShapeDtypeStruct((N, nsplit, C), jnp.float32)),
        grid=(N, nsplit, k_per_split),
        in_specs=[
            pl.BlockSpec((1, C, _SUB, lt), lambda n, s, k: (n, 0, 0, s * k_per_split + k)),
            pl.BlockSpec((1, 1, _SUB, lt), lambda n, s, k: (n, 0, 0, s * k_per_split + k)),
        ],
        out_specs=(
            pl.BlockSpec((1, 1, C), lambda n, s, k: (n, s, 0)),
            pl.BlockSpec((1, 1, C), lambda n, s, k: (n, s, 0)),
        ),
        scratch_shapes=[pltpu.VMEM((C, _SUB, 128), jnp.float32),
                        pltpu.VMEM((C, _SUB, 128), jnp.float32)],
        compiler_params=pltpu.CompilerParams(
            dimension_semantics=("parallel", "parallel", "arbitrary"),
            vmem_limit_bytes=vmem_limit),
    )(pred_r, tgt_r)

    num_s = jnp.sum(num_p, axis=1)               # (N, C)
    den_s = jnp.sum(den_p, axis=1)               # (N, C)
    num = 2.0 * num_s + smooth
    den = den_s + smooth
    per_bc = 1.0 - num / den                     # (N, C) per-batch / per-class dice loss

    # binary_dice_loss is @weighted_loss (default 'mean') -> mean over the batch dim.
    per_class = jnp.mean(per_bc, axis=0)         # (C,)
    if class_weight is not None:
        per_class = per_class * jnp.asarray(class_weight, dtype=jnp.float32)
    if 0 <= int(ignore_index) < C:               # dice_loss skips class i == ignore_index
        per_class = per_class * (jnp.arange(C) != int(ignore_index)).astype(jnp.float32)
    total = jnp.sum(per_class) / C
    # outer weighted_loss: reduction of a scalar ('none'/'mean'/'sum') is the identity.
    return loss_weight * total


def _dice_loss_reference(pred, target, *, smooth=1.0, exponent=2, class_weight=None,
                         loss_weight=1.0, ignore_index=255):
    """Pure-JAX reference matching the PyTorch module (f32 math)."""
    N, C, H, W = pred.shape
    p = jax.nn.softmax(pred.astype(jnp.float32), axis=1)
    t = target.astype(jnp.int32)
    one_hot = jnp.moveaxis(jax.nn.one_hot(jnp.clip(t, 0, C - 1), C, dtype=jnp.float32), -1, 1)
    valid = (t != ignore_index).astype(jnp.float32)[:, None]
    pr = p.reshape(N, C, -1)
    oh = one_hot.reshape(N, C, -1)
    vm = valid.reshape(N, 1, -1)
    num = jnp.sum(pr * oh * vm, axis=-1) * 2.0 + smooth
    den = jnp.sum(pr ** exponent + oh ** exponent, axis=-1) + smooth
    per_class = jnp.mean(1.0 - num / den, axis=0)
    if class_weight is not None:
        per_class = per_class * jnp.asarray(class_weight, dtype=jnp.float32)
    if 0 <= int(ignore_index) < C:
        per_class = per_class * (jnp.arange(C) != int(ignore_index)).astype(jnp.float32)
    return loss_weight * jnp.sum(per_class) / C


def _check_close(a, b, tol=2e-3):
    a = float(a)
    b = float(b)
    assert abs(a - b) <= tol * max(1.0, abs(b)), (a, b)


if __name__ == "__main__":
    key = jax.random.PRNGKey(0)
    k1, k2, k3, k4, k5, k6 = jax.random.split(key, 6)

    # --- case 1: small f32, N=2, single full-extent tile (direct path, no mask) -----
    N, C, H, W = 2, 4, 16, 16
    pred = jax.random.normal(k1, (N, C, H, W), dtype=jnp.float32)
    raw = jax.random.randint(k2, (N, H, W), 0, C + 1)
    target = jnp.where(raw == C, 255, raw).astype(jnp.int32)

    loss = dice_loss_forward(pred, target, smooth=1.0, exponent=2, loss_weight=1.0,
                             ignore_index=255, reduction='mean')
    loss = jax.block_until_ready(loss)
    ref = _dice_loss_reference(pred, target, smooth=1.0, exponent=2, ignore_index=255)
    assert loss.shape == () and jnp.isfinite(loss)
    _check_close(loss, ref)

    # --- case 2: bf16 pred, N=1, forced lane tiling with lane padding + mask ---------
    N2, C2, H2, W2 = 1, 5, 40, 40
    pred2 = jax.random.normal(k3, (N2, C2, H2, W2), dtype=jnp.float32).astype(jnp.bfloat16)
    raw2 = jax.random.randint(k4, (N2, H2, W2), 0, C2 + 1)
    target2 = jnp.where(raw2 == C2, 255, raw2).astype(jnp.int32)
    cw = [0.5, 1.0, 1.5, 2.0, 1.0]

    loss2 = dice_loss_forward(pred2, target2, smooth=1.0, exponent=2, class_weight=cw,
                              loss_weight=0.7, ignore_index=255, reduction='mean',
                              lane_tile=128)       # L=200 -> 2 tiles, lane pad, masked
    loss2 = jax.block_until_ready(loss2)
    ref2 = _dice_loss_reference(pred2, target2, smooth=1.0, exponent=2, class_weight=cw,
                                loss_weight=0.7, ignore_index=255)
    assert loss2.shape == () and jnp.isfinite(loss2)
    _check_close(loss2, ref2)

    # --- case 3: non-default exponent path --------------------------------------------
    loss3 = dice_loss_forward(pred, target, smooth=1.0, exponent=3, ignore_index=255)
    loss3 = jax.block_until_ready(loss3)
    ref3 = _dice_loss_reference(pred, target, smooth=1.0, exponent=3, ignore_index=255)
    assert loss3.shape == () and jnp.isfinite(loss3)
    _check_close(loss3, ref3)

    # --- case 4: multi-tile divisor path (chunked scratch accumulation, no mask) ------
    N4, C4, H4, W4 = 2, 4, 64, 64
    pred4 = jax.random.normal(k5, (N4, C4, H4, W4), dtype=jnp.float32)
    raw4 = jax.random.randint(k6, (N4, H4, W4), 0, C4 + 1)
    target4 = jnp.where(raw4 == C4, 255, raw4).astype(jnp.int32)

    loss4 = dice_loss_forward(pred4, target4, smooth=1.0, exponent=2, ignore_index=255,
                              lane_tile=128)       # L=512 -> 4 unmasked tiles
    loss4 = jax.block_until_ready(loss4)
    ref4 = _dice_loss_reference(pred4, target4, smooth=1.0, exponent=2, ignore_index=255)
    assert loss4.shape == () and jnp.isfinite(loss4)
    _check_close(loss4, ref4)

    print("KERNEL_OK")
</pallas_src>

<mosaic_0001>
module attributes {stable_mosaic.version = 11 : i64} {
  func.func @_dice_partial_kernel(%arg0: i32, %arg1: i32, %arg2: i32, %arg3: memref<1x4x8x32xf32, #tpu.memory_space<vmem>>, %arg4: memref<1x1x8x32xi32, #tpu.memory_space<vmem>>, %arg5: memref<1x1x4xf32, #tpu.memory_space<vmem>>, %arg6: memref<1x1x4xf32, #tpu.memory_space<vmem>>, %arg7: memref<4x8x128xf32, #tpu.memory_space<vmem>>, %arg8: memref<4x8x128xf32, #tpu.memory_space<vmem>>) attributes {dimension_semantics = [#tpu.dimension_semantics<parallel>, #tpu.dimension_semantics<parallel>, #tpu.dimension_semantics<arbitrary>], iteration_bounds = array<i64: 2, 1, 1>, scalar_prefetch = 0 : i64, scratch_operands = 2 : i64, tpu.core_type = #tpu.core_type<tc>, window_params = [{transform_indices = @transform_0, window_bounds = array<i64: 1, 4, 8, 32>}, {transform_indices = @transform_1, window_bounds = array<i64: 1, 1, 8, 32>}, {transform_indices = @transform_2, window_bounds = array<i64: 1, 1, 4>}, {transform_indices = @transform_3, window_bounds = array<i64: 1, 1, 4>}]} {
    %c0 = arith.constant 0 : index
    %c0_0 = arith.constant 0 : index
    %c0_1 = arith.constant 0 : index
    %c0_2 = arith.constant 0 : index
    %0 = vector.load %arg3[%c0, %c0_0, %c0_1, %c0_2] : memref<1x4x8x32xf32, #tpu.memory_space<vmem>>, vector<1x4x8x32xf32>
    %1 = vector.shape_cast %0 : vector<1x4x8x32xf32> to vector<4x8x32xf32>
    %c0_3 = arith.constant 0 : index
    %c0_4 = arith.constant 0 : index
    %c0_5 = arith.constant 0 : index
    %c0_6 = arith.constant 0 : index
    %2 = vector.load %arg4[%c0_3, %c0_4, %c0_5, %c0_6] : memref<1x1x8x32xi32, #tpu.memory_space<vmem>>, vector<1x1x8x32xi32>
    %3 = vector.shape_cast %2 : vector<1x1x8x32xi32> to vector<8x32xi32>
    %cst = arith.constant dense<0xFF800000> : vector<8x32xf32>
    %4 = vector.multi_reduction <maximumf>, %1, %cst [0] : vector<4x8x32xf32> to vector<8x32xf32>
    %5 = vector.shape_cast %4 : vector<8x32xf32> to vector<1x8x32xf32>
    %6 = vector.broadcast %5 : vector<1x8x32xf32> to vector<4x8x32xf32>
    %7 = arith.subf %1, %6 : vector<4x8x32xf32>
    %8 = math.exp %7 : vector<4x8x32xf32>
    %cst_7 = arith.constant dense<0.000000e+00> : vector<8x32xf32>
    %9 = vector.multi_reduction <add>, %8, %cst_7 [0] : vector<4x8x32xf32> to vector<8x32xf32>
    %cst_8 = arith.constant 1.000000e+00 : f32
    %10 = vector.broadcast %cst_8 : f32 to vector<8x32xf32>
    %11 = arith.divf %10, %9 : vector<8x32xf32>
    %12 = vector.shape_cast %11 : vector<8x32xf32> to vector<1x8x32xf32>
    %13 = vector.broadcast %12 : vector<1x8x32xf32> to vector<4x8x32xf32>
    %14 = arith.mulf %8, %13 : vector<4x8x32xf32>
    %c0_i32 = arith.constant 0 : i32
    %c3_i32 = arith.constant 3 : i32
    %15 = vector.broadcast %c0_i32 : i32 to vector<8x32xi32>
    %16 = arith.maxsi %15, %3 : vector<8x32xi32>
    %17 = vector.broadcast %c3_i32 : i32 to vector<8x32xi32>
    %18 = arith.minsi %17, %16 : vector<8x32xi32>
    %c255_i32 = arith.constant 255 : i32
    %19 = vector.broadcast %c255_i32 : i32 to vector<8x32xi32>
    %20 = arith.cmpi ne, %3, %19 : vector<8x32xi32>
    %21 = tpu.iota {dimensions = array<i32: 0>} : vector<4x8x32xi32>
    %22 = vector.shape_cast %18 : vector<8x32xi32> to vector<1x8x32xi32>
    %23 = vector.broadcast %22 : vector<1x8x32xi32> to vector<4x8x32xi32>
    %24 = arith.cmpi eq, %21, %23 : vector<4x8x32xi32>
    %25 = arith.mulf %14, %14 : vector<4x8x32xf32>
    %26 = arith.extui %24 : vector<4x8x32xi1> to vector<4x8x32xi32>
    %27 = arith.sitofp %26 : vector<4x8x32xi32> to vector<4x8x32xf32>
    %28 = arith.addf %25, %27 : vector<4x8x32xf32>
    %29 = vector.shape_cast %20 : vector<8x32xi1> to vector<1x8x32xi1>
    %30 = vector.broadcast %29 : vector<1x8x32xi1> to vector<4x8x32xi1>
    %31 = arith.andi %24, %30 : vector<4x8x32xi1>
    %cst_9 = arith.constant 0.000000e+00 : f32
    %32 = vector.broadcast %cst_9 : f32 to vector<4x8x32xf32>
    %33 = arith.select %31, %14, %32 : vector<4x8x32xi1>, vector<4x8x32xf32>
    %cst_10 = arith.constant dense<0.000000e+00> : vector<4x8xf32>
    %34 = vector.multi_reduction <add>, %33, %cst_10 [2] : vector<4x8x32xf32> to vector<4x8xf32>
    %cst_11 = arith.constant dense<0.000000e+00> : vector<4xf32>
    %35 = vector.multi_reduction <add>, %34, %cst_11 [1] : vector<4x8xf32> to vector<4xf32>
    %c0_12 = arith.constant 0 : index
    %c0_13 = arith.constant 0 : index
    %c0_14 = arith.constant 0 : index
    %36 = vector.load %arg5[%c0_12, %c0_13, %c0_14] : memref<1x1x4xf32, #tpu.memory_space<vmem>>, vector<1x1x4xf32>
    %37 = vector.shape_cast %36 : vector<1x1x4xf32> to vector<4xf32>
    %38 = vector.shape_cast %35 : vector<4xf32> to vector<1x1x4xf32>
    tpu.vector_store %arg5[%c0_12, %c0_13, %c0_14], %38 {strides = array<i32>} : memref<1x1x4xf32, #tpu.memory_space<vmem>>, vector<1x1x4xf32>,
    %cst_15 = arith.constant dense<0.000000e+00> : vector<4x8xf32>
    %39 = vector.multi_reduction <add>, %28, %cst_15 [2] : vector<4x8x32xf32> to vector<4x8xf32>
    %cst_16 = arith.constant dense<0.000000e+00> : vector<4xf32>
    %40 = vector.multi_reduction <add>, %39, %cst_16 [1] : vector<4x8xf32> to vector<4xf32>
    %c0_17 = arith.constant 0 : index
    %c0_18 = arith.constant 0 : index
    %c0_19 = arith.constant 0 : index
    %41 = vector.load %arg6[%c0_17, %c0_18, %c0_19] : memref<1x1x4xf32, #tpu.memory_space<vmem>>, vector<1x1x4xf32>
    %42 = vector.shape_cast %41 : vector<1x1x4xf32> to vector<4xf32>
    %43 = vector.shape_cast %40 : vector<4xf32> to vector<1x1x4xf32>
    tpu.vector_store %arg6[%c0_17, %c0_18, %c0_19], %43 {strides = array<i32>} : memref<1x1x4xf32, #tpu.memory_space<vmem>>, vector<1x1x4xf32>,
    return
  }
  func.func @transform_0(%arg0: i32, %arg1: i32, %arg2: i32) -> (i32, i32, i32, i32) {
    %c1_i32 = arith.constant 1 : i32
    %0 = arith.muli %arg1, %c1_i32 : i32
    %1 = arith.addi %0, %arg2 : i32
    %c0_i32 = arith.constant 0 : i32
    %c0_i32_0 = arith.constant 0 : i32
    %c0_i32_1 = arith.constant 0 : i32
    return %arg0, %c0_i32, %c0_i32_0, %1 : i32, i32, i32, i32
  }
  func.func @transform_1(%arg0: i32, %arg1: i32, %arg2: i32) -> (i32, i32, i32, i32) {
    %c1_i32 = arith.constant 1 : i32
    %0 = arith.muli %arg1, %c1_i32 : i32
    %1 = arith.addi %0, %arg2 : i32
    %c0_i32 = arith.constant 0 : i32
    %c0_i32_0 = arith.constant 0 : i32
    %c0_i32_1 = arith.constant 0 : i32
    return %arg0, %c0_i32, %c0_i32_0, %1 : i32, i32, i32, i32
  }
  func.func @transform_2(%arg0: i32, %arg1: i32, %arg2: i32) -> (i32, i32, i32) {
    %c0_i32 = arith.constant 0 : i32
    %c0_i32_0 = arith.constant 0 : i32
    return %arg0, %arg1, %c0_i32 : i32, i32, i32
  }
  func.func @transform_3(%arg0: i32, %arg1: i32, %arg2: i32) -> (i32, i32, i32) {
    %c0_i32 = arith.constant 0 : i32
    %c0_i32_0 = arith.constant 0 : i32
    return %arg0, %arg1, %c0_i32 : i32, i32, i32
  }
}

</mosaic_0001>

<bundles_post_ra>
// kernel: tpu_custom_call.1
= control target key start
LH: loop header
LB: loop body
LE: loop exit
PB: predicated region body
PF: predicated region fallthrough
CT: control target
= control target key end

     0   :  { %9 = vsyncpa [#allocation5], 0  ;;  %s1223_s0 = inlined_call_operand.hbm [shape: f32[2,4,8,32], index: 0, kind: input, shape index: {}]   ;;  %s1224_s1 = inlined_call_operand.hbm [shape: s32[2,1,8,32], index: 1, kind: input, shape index: {}]   ;;  %s1225_s2 = inlined_call_operand.hbm [shape: f32[2,1,4], index: 2, kind: output, shape index: {0}]   ;;  %s1226_s3 = inlined_call_operand.hbm [shape: f32[2,1,4], index: 3, kind: output, shape index: {1}]  }
   0x1   :  { %11 = vsyncpa [#allocation5 + $0x1], 0 }
   0x2   :  { %12 = vsyncpa [#allocation8], 0 }
   0x3   :  { %14 = vsyncpa [#allocation8 + $0x1], 0 }
   0x4   :  { %15 = vsyncpa [#allocation6], 0 }
   0x5   :  { %17 = vsyncpa [#allocation6 + $0x1], 0 }
   0x6   :  { %18 = vsyncpa [#allocation11], 0 }
   0x7   :  { %20 = vsyncpa [#allocation11 + $0x1], 0  ;;  %s921_s12 = smov 0   ;;  %s923_s13 = smov 0  }
   0x8   :  { %s925_s14 = smov 0   ;;  %s927_s15 = smov 0  }
   0x9   :  { %s929_s16 = smov 0   ;;  %s931_s17 = smov 0  }
   0xa LB: > { %s608_s18 = sadd.s32 4294967295, %s892_s17   ;;  %s609_s19 = sadd.s32 4294967294, %s892_s17   ;;  %s892_s17 = sphi %s931_s17, %s26_s17   ;;  %s888_s16 = sphi %s929_s16, %s1249_s16   ;;  %s884_s15 = sphi %s927_s15, %s1248_s15   ;;  %s880_s14 = sphi %s925_s14, %s1247_s14   ;;  %s876_s13 = sphi %s923_s13, %s1246_s13   ;;  %s872_s12 = sphi %s921_s12, %s1245_s12  }
   0xb   : > { %s45_s20 = sadd.s32 1, %s888_s16  ;;  %s56_s21 = sadd.s32 1, %s880_s14 }
   0xc   : > { %p47_p0 = scmp.ge.s32.totalorder %s45_s20, 2  ;;  %p63_p1 = scmp.ne.s32.totalorder %s880_s14, %s876_s13 }
   0xd   : > { %p64_p2 = scmp.eq.s32.totalorder %s892_s17, 0  ;;  %p69_p3 = scmp.ne.s32.totalorder %s876_s13, %s872_s12 }
   0xe   : > { %s1251_s20 = smov (%p47_p0, %s45_s20), 0  ;;  %p70_p5 = scmp.eq.s32.totalorder %s608_s18, 0 }
   0xf   : > { %p962_p4 = por %p64_p2, %p63_p1  ;;  %s51_s23 = ssub.s32 %s888_s16, %s1251_s20 }
  0x10   : > { %p125_p6 = scmp.eq.s32.totalorder %s608_s18, 1  ;;  %p54_p7 = scmp.eq.s32.totalorder %s51_s23, 0 }
  0x11   : > { %p968_p8 = por %p70_p5, %p69_p3  ;;  %p131_p10 = scmp.eq.s32.totalorder %s609_s19, 1 }
  0x12   : > { %p972_p9 = por %p125_p6, %p63_p1  ;;  %p651_p13 = scmp.lt.s32.totalorder %s892_s17, 2 }
  0x13   : > { %s1230_s24 = scalar_select %p968_p8, 1, 0 }
  0x14   : > { %s1231_s25 = scalar_select %p972_p9, 1, 0 }
  0x15   : > { %s977_s26 = scalar_select %p54_p7, %s880_s14, %s56_s21  }
  0x16   : > { %p979_p11 = por %p131_p10, %p69_p3  ;;  %s986_s28 = sand.u32 1, %s880_s14  }
  0x17   : > { %s612_s29 = sshll.u32 %s986_s28, 5  ;;  %s628_s30 = sshll.u32 %s888_s16, 9 }
  0x18   : > { %s1232_s27 = scalar_select %p979_p11, 1, 0 }
  0x19   : > { %s993_s6 = scalar_lea.hbm %s1223_s0, %s628_s30  ;;  %s183_s7 = scalar_lea.vmem [#allocation4], %s612_s29 }
  0x1a   : > { %s192_s8 = sshll.u32 %s183_s7, 4  ;;  %p999_p0 = pnand %p651_p13, %p962_p4  ;;  %s995_s8 = int_to_ptr.vmem [resolvable:$true] %s192_s8 }
  0x1b   : > { %s180_s10 = scalar_lea.sflag [#allocation5], %s986_s28  ;;  %s714_s11 = scalar_lea.hbm %s993_s6, 512 }
  0x1c   : > { %p715_p2 = scmp.ne.s32.totalorder %s993_s6, %s714_s11  ;;  %p716_p3 = pneg %p999_p0 }
  0x1d   : > { %s719_s21 = scalar_lea.hbm %s1223_s0, 1024  ;;  %p720_p4 = scmp.lt.u32.totalorder %s993_s6, %s1223_s0 }
  0x1e   : > { %p717_p5 = pnand %p716_p3, %p715_p2  ;;  %p721_p7 = scmp.lt.u32.totalorder %s719_s21, %s714_s11 }
  0x1f   : > { %p723_p13 = scmp.lt.u32.totalorder %s714_s11, %s993_s6 }
  0x20   : > { %p718_p6 = pneg %p717_p5  ;;  %p722_p10 = por %p721_p7, %p720_p4 }
  0x22   : > { %p724_p12 = por %p723_p13, %p722_p10 }
  0x24   : > { %p725_p1 = pnand %p724_p12, %p718_p6 }
  0x26   : > { %728 = shalt.err (!%p725_p1)
}
  0x27   : > { %s729_s29 = scalar_lea.vmem %s995_s8, 512  ;;  %s894_s30 = smov [#allocation4]  }
  0x28   : > { %p730_p2 = scmp.ne.s32.totalorder %s995_s8, %s729_s29  ;;  %s734_s4 = sshll.u32 %s894_s30, 4  ;;  %s735_s4 = int_to_ptr.vmem [resolvable:$false] %s734_s4 }
  0x29   : > { %s736_s5 = scalar_lea.vmem %s735_s4, 1024  ;;  %p737_p9 = scmp.lt.s32.totalorder %s995_s8, %s735_s4 }
  0x2a   : > { %p732_p5 = pnand %p730_p2, %p716_p3  ;;  %p738_p4 = scmp.lt.s32.totalorder %s736_s5, %s729_s29 }
  0x2c   : > { %p733_p11 = pneg %p732_p5  ;;  %p739_p7 = por %p738_p4, %p737_p9 }
  0x2e   : > { %p740_p10 = pnand %p739_p7, %p733_p11 }
  0x30   : > { %743 = shalt.err (!%p740_p10)
}
  0x31   : > { %s895_s7 = smov 128   ;;  %s896_s11 = smov 8  }
  0x32   : > { %640 = dma.hbm_to_vmem [thread:$0]  (!%p999_p0), %s993_s6, 512, %s995_s8, %s180_s10, %s895_s7, %s895_s7, %s896_s11  }
  0x33   : > { %p220_p12 = scmp.lt.s32.totalorder %s892_s17, 3  ;;  %s615_s18 = sshll.u32 %s986_s28, 3 }
  0x34   : > { %s616_s19 = sshll.u32 %s888_s16, 7  ;;  %p1234_p9 = scmp.ge.s32.totalorder %s892_s17, 1 }
  0x35   : > { %s1044_s29 = scalar_lea.hbm %s1224_s1, %s616_s19  ;;  %s206_s30 = scalar_lea.vmem [#allocation7], %s615_s18 }
  0x36   : > { %p1037_p11 = pnand %p1234_p9, %p220_p12  ;;  %s215_s4 = sshll.u32 %s206_s30, 4  ;;  %s216_s4 = int_to_ptr.vmem [resolvable:$true] %s215_s4 }
  0x37   : > { %s203_s6 = scalar_lea.sflag [#allocation8], %s986_s28  ;;  %s744_s8 = scalar_lea.hbm %s1044_s29, 128 }
  0x38   : > { %s1235_s21 = scalar_select %p1037_p11, 1, 0 }
  0x39   : > { %p745_p1 = scmp.ne.s32.totalorder %s1044_s29, %s744_s8  ;;  %s749_s7 = scalar_lea.hbm %s1224_s1, 256 }
  0x3a   : > { %p750_p2 = scmp.lt.u32.totalorder %s1044_s29, %s1224_s1  ;;  %p751_p5 = scmp.lt.u32.totalorder %s749_s7, %s744_s8 }
  0x3b   : > { %p747_p6 = pnand %p745_p1, %p716_p3  ;;  %p753_p7 = scmp.lt.u32.totalorder %s744_s8, %s1044_s29 }
  0x3c   : > { %p752_p4 = por %p751_p5, %p750_p2 }
  0x3d   : > { %p748_p13 = pneg %p747_p6 }
  0x3e   : > { %p754_p10 = por %p753_p7, %p752_p4 }
  0x40   : > { %p755_p12 = pnand %p754_p10, %p748_p13 }
  0x42   : > { %758 = shalt.err (!%p755_p12)
}
  0x43   : > { %s759_s28 = scalar_lea.vmem %s216_s4, 128  ;;  %s897_s18 = smov [#allocation7]  }
  0x44   : > { %p760_p9 = scmp.ne.s32.totalorder %s216_s4, %s759_s28  ;;  %s764_s22 = sshll.u32 %s897_s18, 4  ;;  %s765_s22 = int_to_ptr.vmem [resolvable:$false] %s764_s22 }
  0x45   : > { %s766_s23 = scalar_lea.vmem %s765_s22, 256  ;;  %p767_p8 = scmp.lt.s32.totalorder %s216_s4, %s765_s22 }
  0x46   : > { %p762_p1 = pnand %p760_p9, %p716_p3  ;;  %p768_p11 = scmp.lt.s32.totalorder %s766_s23, %s759_s28 }
  0x48   : > { %p763_p6 = pneg %p762_p1  ;;  %p769_p2 = por %p768_p11, %p767_p8 }
  0x4a   : > { %p770_p5 = pnand %p769_p2, %p763_p6 }
  0x4c   : > { %773 = shalt.err (!%p770_p5)
}
  0x4d   : > { %643 = dma.hbm_to_vmem [thread:$0]  (!%p999_p0), %s1044_s29, 128, %s216_s4, %s203_s6  }
  0x4e   : > { %p1236_p13 = scmp.ne.s32.totalorder %s1235_s21, 0 }
  0x4f   : > { %s1069_s30 = sand.u32 (!%p1236_p13), 1, %s876_s13   ;;  %p1237_p3 = scmp.ne.s32.totalorder (!%p1236_p13), %s1230_s24, 0 }
  0x50   : > { %224 = sbr.rel (%p1236_p13) target bundleno = 476 (0x1dc), region = 28  ;;  %s618_s8 = sshll.u32 (!%p1236_p13), %s1069_s30, 5 }
  0x51   : > { %s227_s10 = scalar_lea.sflag (!%p1236_p13), [#allocation5], %s1069_s30  ;;  %s230_s5 = scalar_lea.vmem (!%p1236_p13), [#allocation4], %s618_s8 }
  0x57   : > { %855 = dma.done.wait (%p1237_p3), %s227_s10, 512  }
  0x58   : > { %857 = vsyncadd (%p1237_p3), %s227_s10, 4294966784  ;;  %s619_s9 = sshll.u32 %s1069_s30, 3  ;;  %s236_s21 = scalar_lea.sflag [#allocation8], %s1069_s30 }
  0x59   : > { %s239_s29 = scalar_lea.vmem [#allocation7], %s619_s9 }
  0x5a   : > { %859 = dma.done.wait (%p1237_p3), %s236_s21, 128  }
  0x5b   : > { %861 = vsyncadd (%p1237_p3), %s236_s21, 4294967168  ;;  %vm277_vm0 = vcmask 261120   ;;  %v272_v0 = vld [vmem:[%s230_s5] sm:$0xff]  ;;  %v273_v1 = vld [vmem:[%s230_s5 + $0x8] sm:$0xff]  ;;  %v898_v38 = vmov 0.0   ;;  %vm379_vm12 = vcmask 1041409  }
  0x5c   : > { %v274_v2 = vld [vmem:[%s230_s5 + $0x10] sm:$0xff]  ;;  %v275_v3 = vld [vmem:[%s230_s5 + $0x18] sm:$0xff]  ;;  %v278_v4 = vsel %vm277_vm0, %v272_v0, -inf  ;;  %v279_v5 = vsel %vm277_vm0, %v273_v1, -inf  ;;  %v276_v20 = vld [vmem:[%s239_s29] sm:$0xff]  ;;  %vm381_vm13 = vcmask 1042434  }
  0x5d   : > { %v280_v6 = vsel %vm277_vm0, %v274_v2, -inf  ;;  %v281_v7 = vsel %vm277_vm0, %v275_v3, -inf  ;;  %v282_v8 = vmax.f32 %v278_v4, %v279_v5  ;;  %vm310_vm1 = vcmp.gt.s32.totalorder %v276_v20, 0  ;;  %s624_s24 = sshll.u32 %s884_s15, 4  ;;  %s263_s4 = scalar_lea.vmem [#allocation9], %s1069_s30 }
  0x5e   : > { %v283_v9 = vmax.f32 %v280_v6, %v281_v7  ;;  %v311_v30 = vsel %vm310_vm1, %v276_v20, 0  ;;  %vm314_vm3 = vcmp.ne.s32.totalorder %v276_v20, 255  ;;  %vm383_vm14 = vcmask 1043459   ;;  %s462_s6 = sshll.u32 %s263_s4, 4  ;;  %s269_s7 = scalar_lea.vmem [#allocation10], %s1069_s30  ;;  %s1142_s6 = int_to_ptr.vmem [resolvable:$true] %s462_s6 }
  0x5f   : > { %vm312_vm2 = vcmp.lt.s32.totalorder %v311_v30, 3  ;;  %vm386_vm15 = vcmask 60416   ;;  %s476_s11 = sshll.u32 %s269_s7, 4  ;;  %s1140_s18 = scalar_lea.hbm %s1225_s2, %s624_s24  ;;  %s1150_s11 = int_to_ptr.vmem [resolvable:$true] %s476_s11 }
  0x60   : > { %v284_v10 = vmax.f32 %v282_v8, %v283_v9  ;;  %v313_v32 = vsel %vm312_vm2, %v311_v30, 3  ;;  %s1148_s23 = scalar_lea.hbm %s1226_s3, %s624_s24  ;;  %s445_s8 = scalar_lea.sflag [#allocation6], %s1069_s30 }
  0x61   : > { %vm315_vm4 = vcmp.eq.s32.totalorder %v313_v32, 0  ;;  %vm316_vm5 = vcmp.eq.s32.totalorder %v313_v32, 1  ;;  %vm317_vm8 = vcmp.eq.s32.totalorder %v313_v32, 2  ;;  %vm318_vm10 = vcmp.eq.s32.totalorder %v313_v32, 3  ;;  %s774_s10 = scalar_lea.vmem %s1142_s6, 16  ;;  %p1242_p0 = scmp.ne.s32.totalorder %s1231_s25, 0 }
  0x62   : > { %v285_v11 = vsub.f32 %v272_v0, %v284_v10  ;;  %v286_v12 = vsub.f32 %v273_v1, %v284_v10  ;;  %v287_v13 = vsub.f32 %v274_v2, %v284_v10  ;;  %v288_v14 = vsub.f32 %v275_v3, %v284_v10  ;;  %vm337_vm6 = vmand %vm315_vm4, %vm314_vm3  ;;  %p775_p8 = scmp.ne.s32.totalorder %s1142_s6, %s774_s10  ;;  %s899_s5 = smov [#allocation9]  }
  0x63   : > { %vm1093_vm7 = vmand %vm316_vm5, %vm314_vm3  ;;  %v620_v39 = vsel %vm315_vm4, 1.0, %v898_v38  ;;  %v621_v40 = vsel %vm316_vm5, 1.0, %v898_v38  ;;  %v622_v52 = vsel %vm317_vm8, 1.0, %v898_v38  ;;  %v623_v59 = vsel %vm318_vm10, 1.0, %v898_v38  ;;  %s778_s9 = sshll.u32 %s899_s5, 4  ;;  %s779_s9 = int_to_ptr.vmem [resolvable:$false] %s778_s9 }
  0x64   : > { %v289_v15 = vmul.f32 1.442695, %v285_v11  ;;  %v291_v16 = vmul.f32 1.442695, %v286_v12  ;;  %v293_v17 = vmul.f32 1.442695, %v287_v13  ;;  %vm1102_vm9 = vmand %vm317_vm8, %vm314_vm3  ;;  %v361_v1 = vlaneseq  ;;  %p776_p11 = pnand %p775_p8, %p1242_p0  ;;  %p781_p7 = scmp.lt.s32.totalorder %s1142_s6, %s779_s9 }
  0x65   : > { %v295_v18 = vmul.f32 1.442695, %v288_v14  ;;  %vm340_vm11 = vmand %vm318_vm10, %vm314_vm3  ;;  %s780_s21 = scalar_lea.vmem %s779_s9, 32 }
  0x66   : > { %704 = vpow2.f32 %v289_v15  ;;  %v362_v3 = vand.u32 127, %v361_v1  ;;  %v364_v4 = vshrl.u32 %v361_v1, 7  ;;  %p777_p4 = pneg %p776_p11  ;;  %p782_p10 = scmp.lt.s32.totalorder %s780_s21, %s774_s10 }
  0x67   : > { %706 = vpow2.f32 %v291_v16 }
  0x68   : > { %708 = vpow2.f32 %v293_v17  ;;  %v1119_v7 = vsub.s32 %v362_v3, %v364_v4  ;;  %p783_p12 = por %p782_p10, %p781_p7 }
  0x69   : > { %710 = vpow2.f32 %v295_v18 }
  0x6a   : > { %p784_p9 = pnand %p783_p12, %p777_p4 }
  0x70   : > { %v705_v19 = vpop.eup %704 }
  0x71   : > { %v707_v21 = vpop.eup %706  ;;  %v297_v22 = vsel %vm277_vm0, %v705_v19, 0.0 }
  0x72   : > { %v709_v23 = vpop.eup %708  ;;  %v298_v24 = vsel %vm277_vm0, %v707_v21, 0.0 }
  0x73   : > { %v711_v25 = vpop.eup %710  ;;  %v299_v26 = vadd.f32 %v298_v24, %v297_v22  ;;  %v300_v27 = vsel %vm277_vm0, %v709_v23, 0.0 }
  0x74   : > { %v302_v28 = vsel %vm277_vm0, %v711_v25, 0.0 }
  0x75   : > { %v301_v29 = vadd.f32 %v300_v27, %v299_v26 }
  0x77   : > { %v303_v31 = vadd.f32 %v302_v28, %v301_v29 }
  0x79   : > { %712 = vrcp.f32 %v303_v31 }
  0x83   : > { %v713_v33 = vpop.eup %712 }
  0x84   : > { %v306_v35 = vmul.f32 %v713_v33, %v705_v19  ;;  %v307_v36 = vmul.f32 %v713_v33, %v707_v21  ;;  %v308_v37 = vmul.f32 %v713_v33, %v709_v23  ;;  %v309_v50 = vmul.f32 %v713_v33, %v711_v25 }
  0x86   : > { %v341_v41 = vsel %vm337_vm6, %v306_v35, 0.0  ;;  %v319_v42 = vmul.f32 %v306_v35, %v306_v35  ;;  %v342_v43 = vsel %vm1093_vm7, %v307_v36, 0.0  ;;  %v320_v44 = vmul.f32 %v307_v36, %v307_v36 }
  0x87   : > { %v345_v45 = vsel %vm277_vm0, %v341_v41, 0.0  ;;  %v321_v49 = vmul.f32 %v308_v37, %v308_v37  ;;  %v348_v51 = vsel %vm277_vm0, %v342_v43, 0.0  ;;  %v343_v54 = vsel %vm1102_vm9, %v308_v37, 0.0 }
  0x88   : > { %346 = vadd.xlane.f32.xlu0 %v345_v45  ;;  %v331_v47 = vadd.f32 %v620_v39, %v319_v42  ;;  %v332_v48 = vadd.f32 %v621_v40, %v320_v44  ;;  %v322_v57 = vmul.f32 %v309_v50, %v309_v50  ;;  %v351_v58 = vsel %vm277_vm0, %v343_v54, 0.0 }
  0x89   : > { %v333_v56 = vadd.f32 %v622_v52, %v321_v49  ;;  %v344_v60 = vsel %vm340_vm11, %v309_v50, 0.0 }
  0x8a   : > { %v398_v53 = vsel %vm277_vm0, %v331_v47, 0.0  ;;  %v401_v55 = vsel %vm277_vm0, %v332_v48, 0.0  ;;  %v334_v62 = vadd.f32 %v623_v59, %v322_v57  ;;  %v354_v63 = vsel %vm277_vm0, %v344_v60, 0.0 }
  0x8b   : > { %399 = vadd.xlane.f32.xlu1 %v398_v53  ;;  %v404_v61 = vsel %vm277_vm0, %v333_v56, 0.0 }
  0x8c   : > { %349 = vadd.xlane.f32.xlu0 %v348_v51  ;;  %v407_v0 = vsel %vm277_vm0, %v334_v62, 0.0  ;;  %vm396_vm0 = vcmask 24576  }
  0x8f   : > { %402 = vadd.xlane.f32.xlu1 %v401_v55 }
  0x90   : > { %352 = vadd.xlane.f32.xlu0 %v351_v58 }
  0x93   : > { %405 = vadd.xlane.f32.xlu1 %v404_v61 }
  0x94   : > { %355 = vadd.xlane.f32.xlu0 %v354_v63 }
  0x97   : > { %408 = vadd.xlane.f32.xlu1 %v407_v0 }
 0x115   : > { %v347_v2 = vpop.xlane.xlu0 %346 }
 0x116   : > { %v366_v10 = vrot.slane %v347_v2, %v1119_v7 }
 0x118   : > { %v400_v5 = vpop.xlane.xlu1 %399 }
 0x119   : > { %v350_v6 = vpop.xlane.xlu0 %349  ;;  %v417_v19 = vrot.slane %v400_v5, %v1119_v7 }
 0x11a   : > { %v370_v11 = vrot.slane %v350_v6, %v1119_v7 }
 0x11c   : > { %v403_v8 = vpop.xlane.xlu1 %402  ;;  %v380_v16 = vsel %vm379_vm12, %v370_v11, %v366_v10 }
 0x11d   : > { %v353_v9 = vpop.xlane.xlu0 %352  ;;  %v421_v14 = vrot.slane %v403_v8, %v1119_v7 }
 0x11e   : > { %v374_v12 = vrot.slane %v353_v9, %v1119_v7 }
 0x11f   : > { %v430_v23 = vsel %vm379_vm12, %v421_v14, %v417_v19 }
 0x120   : > { %v406_v13 = vpop.xlane.xlu1 %405  ;;  %v382_v20 = vsel %vm381_vm13, %v374_v12, %v380_v16 }
 0x121   : > { %v356_v15 = vpop.xlane.xlu0 %355  ;;  %v425_v17 = vrot.slane %v406_v13, %v1119_v7 }
 0x122   : > { %v378_v18 = vrot.slane %v356_v15, %v1119_v7 }
 0x123   : > { %v431_v26 = vsel %vm381_vm13, %v425_v17, %v430_v23 }
 0x124   : > { %v409_v21 = vpop.xlane.xlu1 %408  ;;  %v384_v22 = vsel %vm383_vm14, %v378_v18, %v382_v20 }
 0x125   : > { %v429_v24 = vrot.slane %v409_v21, %v1119_v7  ;;  %v387_v25 = vsel %vm386_vm15, %v384_v22, 0.0 }
 0x126   : > { %388 = vadd.xlane.f32.xlu0 %v387_v25 }
 0x127   : > { %v432_v27 = vsel %vm383_vm14, %v429_v24, %v431_v26 }
 0x128   : > { %v434_v28 = vsel %vm386_vm15, %v432_v27, 0.0 }
 0x129   : > { %435 = vadd.xlane.f32.xlu1 %v434_v28 }
 0x1b3   : > { %v389_v29 = vpop.xlane.xlu0 %388 }
 0x1b4   : > { %v394_v30 = vrot.slane %v389_v29, %v1119_v7 }
 0x1b6   : > { %v436_v31 = vpop.xlane.xlu1 %435  ;;  %397 = vst.msk [vmem:[%s263_s4] sm:$0x1] %vm396_vm0, %v394_v30 }
 0x1b7   : > { %v441_v32 = vrot.slane %v436_v31, %v1119_v7 }
 0x1b8   : > { %787 = shalt.err (!%p784_p9)
}
 0x1b9   : > { %s788_s29 = scalar_lea.hbm %s1140_s18, 16  ;;  %s792_s19 = scalar_lea.hbm %s1225_s2, 32 }
 0x1ba   : > { %p789_p1 = scmp.ne.s32.totalorder %s1140_s18, %s788_s29  ;;  %p793_p5 = scmp.lt.u32.totalorder %s1140_s18, %s1225_s2 }
 0x1bb   : > { %p794_p13 = scmp.lt.u32.totalorder %s792_s19, %s788_s29  ;;  %p796_p8 = scmp.lt.u32.totalorder %s788_s29, %s1140_s18 }
 0x1bc   : > { %p790_p6 = pnand %p789_p1, %p1242_p0 }
 0x1bd   : > { %p795_p3 = por %p794_p13, %p793_p5 }
 0x1be   : > { %p791_p2 = pneg %p790_p6 }
 0x1bf   : > { %p797_p11 = por %p796_p8, %p795_p3 }
 0x1c1   : > { %p798_p4 = pnand %p797_p11, %p791_p2 }
 0x1c3   : > { %801 = shalt.err (!%p798_p4)
}
 0x1c4   : > { %633 = dma.vmem_to_hbm [thread:$0]  (%p1242_p0), %s1142_s6, 16, %s1140_s18, %s445_s8   ;;  %443 = vst.msk [vmem:[%s269_s7] sm:$0x1] %vm396_vm0, %v441_v32 }
 0x1c5   : > { %s449_s22 = scalar_lea.sflag [#allocation11], %s1069_s30  ;;  %s802_s10 = scalar_lea.vmem %s1150_s11, 16 }
 0x1c6   : > { %p803_p7 = scmp.ne.s32.totalorder %s1150_s11, %s802_s10  ;;  %s900_s5 = smov [#allocation10]  }
 0x1c7   : > { %s806_s9 = sshll.u32 %s900_s5, 4  ;;  %s807_s9 = int_to_ptr.vmem [resolvable:$false] %s806_s9 }
 0x1c8   : > { %p804_p10 = pnand %p803_p7, %p1242_p0  ;;  %s808_s21 = scalar_lea.vmem %s807_s9, 32 }
 0x1c9   : > { %p809_p9 = scmp.lt.s32.totalorder %s1150_s11, %s807_s9  ;;  %p810_p1 = scmp.lt.s32.totalorder %s808_s21, %s802_s10 }
 0x1ca   : > { %p805_p12 = pneg %p804_p10 }
 0x1cb   : > { %p811_p6 = por %p810_p1, %p809_p9 }
 0x1cd   : > { %p812_p2 = pnand %p811_p6, %p805_p12 }
 0x1cf   : > { %815 = shalt.err (!%p812_p2)
}
 0x1d0   : > { %s816_s30 = scalar_lea.hbm %s1148_s23, 16  ;;  %s820_s18 = scalar_lea.hbm %s1226_s3, 32 }
 0x1d1   : > { %p817_p5 = scmp.ne.s32.totalorder %s1148_s23, %s816_s30  ;;  %p821_p8 = scmp.lt.u32.totalorder %s1148_s23, %s1226_s3 }
 0x1d2   : > { %p822_p11 = scmp.lt.u32.totalorder %s820_s18, %s816_s30  ;;  %p824_p7 = scmp.lt.u32.totalorder %s816_s30, %s1148_s23 }
 0x1d3   : > { %p818_p13 = pnand %p817_p5, %p1242_p0 }
 0x1d4   : > { %p823_p4 = por %p822_p11, %p821_p8 }
 0x1d5   : > { %p819_p3 = pneg %p818_p13 }
 0x1d6   : > { %p825_p10 = por %p824_p7, %p823_p4 }
 0x1d8   : > { %p826_p12 = pnand %p825_p10, %p819_p3 }
 0x1da   : > { %829 = shalt.err (!%p826_p12)
}
 0x1db   : > { %634 = dma.vmem_to_hbm [thread:$0]  (%p1242_p0), %s1150_s11, 16, %s1148_s23, %s449_s22  }
 0x1dc PF: > { %s488_s24 = sand.u32 1, %s872_s12   ;;  %p1243_p9 = scmp.ne.s32.totalorder %s1232_s27, 0 }
 0x1dd   : > { %p1244_p1 = scmp.ge.s32.totalorder %s892_s17, 2  ;;  %s489_s4 = scalar_lea.sflag [#allocation6], %s488_s24 }
 0x1df   : > { %p645_p6 = pnand %p1244_p1, %p1243_p9 }
 0x1e1   : > { %863 = dma.done.wait (!%p645_p6), %s489_s4, 16  }
 0x1e2   : > { %865 = vsyncadd (!%p645_p6), %s489_s4, 4294967280  ;;  %s497_s19 = scalar_lea.sflag [#allocation11], %s488_s24 }
 0x1e3   : > { %867 = dma.done.wait (!%p645_p6), %s497_s19, 16  }
 0x1e4   : > { %869 = vsyncadd (!%p645_p6), %s497_s19, 4294967280  ;;  %s26_s17 = sadd.s32 1, %s892_s17   ;;  %s1245_s12 = smov %s876_s13 }
 0x1e5   : > { %p23_p2 = scmp.ge.s32.totalorder %s26_s17, 4   ;;  %s1246_s13 = smov %s880_s14 }
 0x1e6   : > { %s1247_s14 = smov %s977_s26  ;;  %s1248_s15 = smov %s888_s16 }
 0x1e7   : > { %s1249_s16 = smov %s1251_s20  ;;  %25 = sbr.rel (!%p23_p2) target bundleno = 10 (0xa), region = 103 }
 0x1ee   :  { %501 = vsyncpa [#allocation5], 1 }
 0x1ef   :  { %503 = vsyncpa [#allocation5 + $0x1], 1 }
 0x1f0   :  { %504 = vsyncpa [#allocation8], 1 }
 0x1f1   :  { %506 = vsyncpa [#allocation8 + $0x1], 1 }
 0x1f2   :  { %507 = vsyncpa [#allocation6], 1 }
 0x1f3   :  { %509 = vsyncpa [#allocation6 + $0x1], 1 }
 0x1f4   :  { %510 = vsyncpa [#allocation11], 1 }
 0x1f5   :  { %512 = vsyncpa [#allocation11 + $0x1], 1 }

</bundles_post_ra>
